<compile_context>
chip_gen: v7x
topology: tpu7x:2x2x1
jax: 0.10.0
libtpu: 0.0.40
codegen_flags: <defaults>
</compile_context>

<pallas_src>
import math
import functools

import jax
import jax.numpy as jnp
from jax import lax
from jax.experimental import pallas as pl
from jax.experimental.pallas import tpu as pltpu


def _flash_attn_kernel(q_ref, k_ref, v_ref, o_ref, m_ref, l_ref, acc_ref, *,
                       scale2):
    """One (head_block, q_tile, kv_tile) step of QKV attention.

    q_ref: (H, C, Tq)   k_ref/v_ref: (H, C, Tk)   o_ref: (H, C, Tq)
    m_ref/l_ref: (H, 1, Tq) f32     acc_ref: (H, C, Tq) f32
    """
    ki = pl.program_id(2)

    @pl.when(ki == 0)
    def _():
        m_ref[...] = jnp.full_like(m_ref, -jnp.inf)
        l_ref[...] = jnp.zeros_like(l_ref)
        acc_ref[...] = jnp.zeros_like(acc_ref)

    q = q_ref[...]                                   # (H, C, Tq), input dtype
    k = k_ref[...]                                   # (H, C, Tk)
    v = v_ref[...]                                   # (H, C, Tk)

    # Apply the full softmax scale once (scale2 = 1/sqrt(C)), only to q.
    q = q * jnp.asarray(scale2, q.dtype)

    # logits w[h, s, t] = sum_c k[h, c, s] * q[h, c, t]  -> (H, Tk, Tq), f32.
    # Contract the channel axis of both operands: no explicit transpose.
    w = lax.dot_general(k, q, (((1,), (1,)), ((0,), (0,))),
                        preferred_element_type=jnp.float32)

    # Online softmax over the kv (sublane) axis.
    m_prev = m_ref[...]                              # (H, 1, Tq)
    m_cur = jnp.max(w, axis=1, keepdims=True)        # (H, 1, Tq)
    m_new = jnp.maximum(m_prev, m_cur)
    alpha = jnp.exp(m_prev - m_new)                  # (H, 1, Tq)
    p = jnp.exp(w - m_new)                           # (H, Tk, Tq), f32

    l_ref[...] = alpha * l_ref[...] + jnp.sum(p, axis=1, keepdims=True)

    # acc[h, c, t] += sum_s v[h, c, s] * p[h, s, t]  -> (H, C, Tq)
    # (probabilities cast back to input dtype, as in the reference).
    acc_ref[...] = alpha * acc_ref[...] + lax.dot_general(
        v, p.astype(v.dtype), (((2,), (1,)), ((0,), (0,))),
        preferred_element_type=jnp.float32)
    m_ref[...] = m_new

    @pl.when(ki == pl.num_programs(2) - 1)
    def _():
        inv_l = pl.reciprocal(l_ref[...], approx=True)   # EUP, ~free slot
        o_ref[...] = (acc_ref[...] * inv_l).astype(o_ref.dtype)


def _pick_tile(t, requested, prefs=(512, 256, 128)):
    if requested is not None:
        assert t % requested == 0, "tile must divide sequence length"
        return requested
    if t <= prefs[0]:
        return t
    for p in prefs:
        if t % p == 0:
            return p
    return t  # fallback: whole axis (always layout-legal)


def qkv_attention_legacy(qkv, n_heads, *, q_tile=None, kv_tile=None,
                         head_block=None):
    """Pallas equivalent of QKVAttentionLegacy.forward.

    :param qkv: [N, H*3*C, T] array of Qs, Ks, Vs.
    :return: [N, H*C, T] array after attention.
    """
    bs, width, length = qkv.shape
    assert width % (3 * n_heads) == 0
    ch = width // (3 * n_heads)
    B = bs * n_heads
    scale2 = 1.0 / math.sqrt(ch)     # == (ch ** -0.25) ** 2, applied once

    # Free metadata reshape of the packed buffer; q/k/v are slot 0/1/2 of
    # axis 1 and are read straight out of HBM by the BlockSpec index_maps.
    qkv4 = qkv.reshape(B, 3, ch, length)

    tq = _pick_tile(length, q_tile)
    tk = _pick_tile(length, kv_tile)

    # Heads per grid step: amortize ~0.35us/step overhead for small heads
    # while keeping the per-step f32 working set modest.
    if head_block is None:
        budget = 4 * 1024 * 1024
        per_head = 4 * (tk * tq            # probabilities tile
                        + ch * (tq + 2 * tk)   # q/k/v tiles
                        + ch * tq          # accumulator
                        + 2 * tq)          # m, l
        head_block = 1
        for h in (8, 4, 2, 1):
            if B % h == 0 and h * per_head <= budget:
                head_block = h
                break
    assert B % head_block == 0

    grid = (B // head_block, length // tq, length // tk)

    q_spec = pl.BlockSpec((head_block, pl.Squeezed(), ch, tq),
                          lambda b, qi, ki: (b, 0, 0, qi))
    k_spec = pl.BlockSpec((head_block, pl.Squeezed(), ch, tk),
                          lambda b, qi, ki: (b, 1, 0, ki))
    v_spec = pl.BlockSpec((head_block, pl.Squeezed(), ch, tk),
                          lambda b, qi, ki: (b, 2, 0, ki))
    o_spec = pl.BlockSpec((head_block, ch, tq),
                          lambda b, qi, ki: (b, 0, qi))

    out = pl.pallas_call(
        functools.partial(_flash_attn_kernel, scale2=scale2),
        out_shape=jax.ShapeDtypeStruct((B, ch, length), qkv.dtype),
        grid=grid,
        in_specs=[q_spec, k_spec, v_spec],
        out_specs=o_spec,
        scratch_shapes=[
            pltpu.VMEM((head_block, 1, tq), jnp.float32),   # running max m
            pltpu.VMEM((head_block, 1, tq), jnp.float32),   # running sum l
            pltpu.VMEM((head_block, ch, tq), jnp.float32),  # output accum
        ],
        compiler_params=pltpu.CompilerParams(
            dimension_semantics=("parallel", "parallel", "arbitrary")),
    )(qkv4, qkv4, qkv4)

    return out.reshape(bs, n_heads * ch, length)


def _reference(qkv, n_heads):
    """Pure-JAX reference mirroring the PyTorch forward."""
    bs, width, length = qkv.shape
    ch = width // (3 * n_heads)
    qkv_r = qkv.reshape(bs * n_heads, 3 * ch, length)
    q, k, v = qkv_r[:, :ch], qkv_r[:, ch:2 * ch], qkv_r[:, 2 * ch:]
    scale = 1.0 / math.sqrt(math.sqrt(ch))
    w = jnp.einsum('bct,bcs->bts', q * scale, k * scale)
    w = jax.nn.softmax(w.astype(jnp.float32), axis=-1).astype(w.dtype)
    a = jnp.einsum('bts,bcs->bct', w, v)
    return a.reshape(bs, -1, length)


if __name__ == "__main__":
    key = jax.random.PRNGKey(0)

    # Test 1: small module-consistent shapes (N=2, heads=2, C=8, T=16).
    n_heads = 2
    N, C, T = 2, 8, 16
    k1, k2 = jax.random.split(key)
    qkv = jax.random.normal(k1, (N, n_heads * 3 * C, T), dtype=jnp.float32)
    out = jax.block_until_ready(qkv_attention_legacy(qkv, n_heads))
    ref = _reference(qkv, n_heads)
    assert out.shape == (N, n_heads * C, T)
    assert jnp.allclose(out, ref, atol=2e-3, rtol=2e-3)

    # Test 2: exercise the flash-style q/kv tiling + multi-head blocking path.
    n_heads2 = 4
    N2, C2, T2 = 2, 32, 256
    qkv2 = jax.random.normal(k2, (N2, n_heads2 * 3 * C2, T2),
                             dtype=jnp.float32)
    out2 = jax.block_until_ready(
        qkv_attention_legacy(qkv2, n_heads2, q_tile=128, kv_tile=128))
    ref2 = _reference(qkv2, n_heads2)
    assert out2.shape == (N2, n_heads2 * C2, T2)
    assert jnp.allclose(out2, ref2, atol=2e-3, rtol=2e-3)

    print("KERNEL_OK")
</pallas_src>

<mosaic_0001>
module attributes {stable_mosaic.version = 11 : i64} {
  func.func @_flash_attn_kernel(%arg0: i32, %arg1: i32, %arg2: i32, %arg3: memref<4x1x8x16xf32, #tpu.memory_space<vmem>>, %arg4: memref<4x1x8x16xf32, #tpu.memory_space<vmem>>, %arg5: memref<4x1x8x16xf32, #tpu.memory_space<vmem>>, %arg6: memref<4x8x16xf32, #tpu.memory_space<vmem>>, %arg7: memref<4x1x16xf32, #tpu.memory_space<vmem>>, %arg8: memref<4x1x16xf32, #tpu.memory_space<vmem>>, %arg9: memref<4x8x16xf32, #tpu.memory_space<vmem>>) attributes {dimension_semantics = [#tpu.dimension_semantics<parallel>, #tpu.dimension_semantics<parallel>, #tpu.dimension_semantics<arbitrary>], iteration_bounds = array<i64: 1, 1, 1>, scalar_prefetch = 0 : i64, scratch_operands = 3 : i64, tpu.core_type = #tpu.core_type<tc>, window_params = [{transform_indices = @transform_0, window_bounds = array<i64: 4, 1, 8, 16>}, {transform_indices = @transform_1, window_bounds = array<i64: 4, 1, 8, 16>}, {transform_indices = @transform_2, window_bounds = array<i64: 4, 1, 8, 16>}, {transform_indices = @transform_3, window_bounds = array<i64: 4, 8, 16>}]} {
    %c0_i32 = arith.constant 0 : i32
    %0 = arith.cmpi eq, %arg2, %c0_i32 : i32
    %1 = arith.extui %0 : i1 to i32
    %c0_i32_0 = arith.constant 0 : i32
    %2 = arith.cmpi ne, %1, %c0_i32_0 : i32
    scf.if %2 {
      %cst_36 = arith.constant 0xFF800000 : f32
      %37 = vector.broadcast %cst_36 : f32 to vector<4x1x16xf32>
      %c0_37 = arith.constant 0 : index
      %c0_38 = arith.constant 0 : index
      %c0_39 = arith.constant 0 : index
      %38 = vector.load %arg7[%c0_37, %c0_38, %c0_39] : memref<4x1x16xf32, #tpu.memory_space<vmem>>, vector<4x1x16xf32>
      tpu.vector_store %arg7[%c0_37, %c0_38, %c0_39], %37 {strides = array<i32>} : memref<4x1x16xf32, #tpu.memory_space<vmem>>, vector<4x1x16xf32>,
      %cst_40 = arith.constant 0.000000e+00 : f32
      %39 = vector.broadcast %cst_40 : f32 to vector<4x1x16xf32>
      %c0_41 = arith.constant 0 : index
      %c0_42 = arith.constant 0 : index
      %c0_43 = arith.constant 0 : index
      %40 = vector.load %arg8[%c0_41, %c0_42, %c0_43] : memref<4x1x16xf32, #tpu.memory_space<vmem>>, vector<4x1x16xf32>
      tpu.vector_store %arg8[%c0_41, %c0_42, %c0_43], %39 {strides = array<i32>} : memref<4x1x16xf32, #tpu.memory_space<vmem>>, vector<4x1x16xf32>,
      %cst_44 = arith.constant 0.000000e+00 : f32
      %41 = vector.broadcast %cst_44 : f32 to vector<4x8x16xf32>
      %c0_45 = arith.constant 0 : index
      %c0_46 = arith.constant 0 : index
      %c0_47 = arith.constant 0 : index
      %42 = vector.load %arg9[%c0_45, %c0_46, %c0_47] : memref<4x8x16xf32, #tpu.memory_space<vmem>>, vector<4x8x16xf32>
      tpu.vector_store %arg9[%c0_45, %c0_46, %c0_47], %41 {strides = array<i32>} : memref<4x8x16xf32, #tpu.memory_space<vmem>>, vector<4x8x16xf32>,
    } else {
    }
    %c0 = arith.constant 0 : index
    %c0_1 = arith.constant 0 : index
    %c0_2 = arith.constant 0 : index
    %c0_3 = arith.constant 0 : index
    %3 = vector.load %arg3[%c0, %c0_1, %c0_2, %c0_3] : memref<4x1x8x16xf32, #tpu.memory_space<vmem>>, vector<4x1x8x16xf32>
    %4 = vector.shape_cast %3 : vector<4x1x8x16xf32> to vector<4x8x16xf32>
    %c0_4 = arith.constant 0 : index
    %c0_5 = arith.constant 0 : index
    %c0_6 = arith.constant 0 : index
    %c0_7 = arith.constant 0 : index
    %5 = vector.load %arg4[%c0_4, %c0_5, %c0_6, %c0_7] : memref<4x1x8x16xf32, #tpu.memory_space<vmem>>, vector<4x1x8x16xf32>
    %6 = vector.shape_cast %5 : vector<4x1x8x16xf32> to vector<4x8x16xf32>
    %c0_8 = arith.constant 0 : index
    %c0_9 = arith.constant 0 : index
    %c0_10 = arith.constant 0 : index
    %c0_11 = arith.constant 0 : index
    %7 = vector.load %arg5[%c0_8, %c0_9, %c0_10, %c0_11] : memref<4x1x8x16xf32, #tpu.memory_space<vmem>>, vector<4x1x8x16xf32>
    %8 = vector.shape_cast %7 : vector<4x1x8x16xf32> to vector<4x8x16xf32>
    %cst = arith.constant 0.353553385 : f32
    %9 = vector.broadcast %cst : f32 to vector<4x8x16xf32>
    %10 = arith.mulf %4, %9 : vector<4x8x16xf32>
    %cst_12 = arith.constant dense<0.000000e+00> : vector<4x16x16xf32>
    %11 = tpu.matmul %6, %10, %cst_12 {dimension_numbers = #tpu.dot_dimension_numbers<[1], [1], [2], [2], [0, 0, 0, 2, 1, 2], [0], [0]>} : vector<4x8x16xf32>, vector<4x8x16xf32>, vector<4x16x16xf32> -> vector<4x16x16xf32>
    %c0_13 = arith.constant 0 : index
    %c0_14 = arith.constant 0 : index
    %c0_15 = arith.constant 0 : index
    %12 = vector.load %arg7[%c0_13, %c0_14, %c0_15] : memref<4x1x16xf32, #tpu.memory_space<vmem>>, vector<4x1x16xf32>
    %cst_16 = arith.constant dense<0xFF800000> : vector<4x16xf32>
    %13 = vector.multi_reduction <maximumf>, %11, %cst_16 [1] : vector<4x16x16xf32> to vector<4x16xf32>
    %14 = vector.shape_cast %13 : vector<4x16xf32> to vector<4x1x16xf32>
    %15 = arith.maximumf %12, %14 : vector<4x1x16xf32>
    %16 = arith.subf %12, %15 : vector<4x1x16xf32>
    %17 = math.exp %16 : vector<4x1x16xf32>
    %18 = vector.broadcast %15 : vector<4x1x16xf32> to vector<4x16x16xf32>
    %19 = arith.subf %11, %18 : vector<4x16x16xf32>
    %20 = math.exp %19 : vector<4x16x16xf32>
    %c0_17 = arith.constant 0 : index
    %c0_18 = arith.constant 0 : index
    %c0_19 = arith.constant 0 : index
    %21 = vector.load %arg8[%c0_17, %c0_18, %c0_19] : memref<4x1x16xf32, #tpu.memory_space<vmem>>, vector<4x1x16xf32>
    %22 = arith.mulf %17, %21 : vector<4x1x16xf32>
    %cst_20 = arith.constant dense<0.000000e+00> : vector<4x16xf32>
    %23 = vector.multi_reduction <add>, %20, %cst_20 [1] : vector<4x16x16xf32> to vector<4x16xf32>
    %24 = vector.shape_cast %23 : vector<4x16xf32> to vector<4x1x16xf32>
    %25 = arith.addf %22, %24 : vector<4x1x16xf32>
    %c0_21 = arith.constant 0 : index
    %c0_22 = arith.constant 0 : index
    %c0_23 = arith.constant 0 : index
    %26 = vector.load %arg8[%c0_21, %c0_22, %c0_23] : memref<4x1x16xf32, #tpu.memory_space<vmem>>, vector<4x1x16xf32>
    tpu.vector_store %arg8[%c0_21, %c0_22, %c0_23], %25 {strides = array<i32>} : memref<4x1x16xf32, #tpu.memory_space<vmem>>, vector<4x1x16xf32>,
    %c0_24 = arith.constant 0 : index
    %c0_25 = arith.constant 0 : index
    %c0_26 = arith.constant 0 : index
    %27 = vector.load %arg9[%c0_24, %c0_25, %c0_26] : memref<4x8x16xf32, #tpu.memory_space<vmem>>, vector<4x8x16xf32>
    %28 = vector.broadcast %17 : vector<4x1x16xf32> to vector<4x8x16xf32>
    %29 = arith.mulf %28, %27 : vector<4x8x16xf32>
    %cst_27 = arith.constant dense<0.000000e+00> : vector<4x8x16xf32>
    %30 = tpu.matmul %8, %20, %cst_27 {dimension_numbers = #tpu.dot_dimension_numbers<[2], [1], [1], [2], [0, 0, 0, 1, 1, 2], [0], [0]>} : vector<4x8x16xf32>, vector<4x16x16xf32>, vector<4x8x16xf32> -> vector<4x8x16xf32>
    %31 = arith.addf %29, %30 : vector<4x8x16xf32>
    %c0_28 = arith.constant 0 : index
    %c0_29 = arith.constant 0 : index
    %c0_30 = arith.constant 0 : index
    %32 = vector.load %arg9[%c0_28, %c0_29, %c0_30] : memref<4x8x16xf32, #tpu.memory_space<vmem>>, vector<4x8x16xf32>
    tpu.vector_store %arg9[%c0_28, %c0_29, %c0_30], %31 {strides = array<i32>} : memref<4x8x16xf32, #tpu.memory_space<vmem>>, vector<4x8x16xf32>,
    %c0_31 = arith.constant 0 : index
    %c0_32 = arith.constant 0 : index
    %c0_33 = arith.constant 0 : index
    %33 = vector.load %arg7[%c0_31, %c0_32, %c0_33] : memref<4x1x16xf32, #tpu.memory_space<vmem>>, vector<4x1x16xf32>
    tpu.vector_store %arg7[%c0_31, %c0_32, %c0_33], %15 {strides = array<i32>} : memref<4x1x16xf32, #tpu.memory_space<vmem>>, vector<4x1x16xf32>,
    %c0_i32_34 = arith.constant 0 : i32
    %34 = arith.cmpi eq, %arg2, %c0_i32_34 : i32
    %35 = arith.extui %34 : i1 to i32
    %c0_i32_35 = arith.constant 0 : i32
    %36 = arith.cmpi ne, %35, %c0_i32_35 : i32
    scf.if %36 {
      %c0_36 = arith.constant 0 : index
      %c0_37 = arith.constant 0 : index
      %c0_38 = arith.constant 0 : index
      %37 = vector.load %arg8[%c0_36, %c0_37, %c0_38] : memref<4x1x16xf32, #tpu.memory_space<vmem>>, vector<4x1x16xf32>
      %38 = tpu.reciprocal %37 {approx = true} : vector<4x1x16xf32> -> vector<4x1x16xf32>
      %c0_39 = arith.constant 0 : index
      %c0_40 = arith.constant 0 : index
      %c0_41 = arith.constant 0 : index
      %39 = vector.load %arg9[%c0_39, %c0_40, %c0_41] : memref<4x8x16xf32, #tpu.memory_space<vmem>>, vector<4x8x16xf32>
      %40 = vector.broadcast %38 : vector<4x1x16xf32> to vector<4x8x16xf32>
      %41 = arith.mulf %39, %40 : vector<4x8x16xf32>
      %c0_42 = arith.constant 0 : index
      %c0_43 = arith.constant 0 : index
      %c0_44 = arith.constant 0 : index
      %42 = vector.load %arg6[%c0_42, %c0_43, %c0_44] : memref<4x8x16xf32, #tpu.memory_space<vmem>>, vector<4x8x16xf32>
      tpu.vector_store %arg6[%c0_42, %c0_43, %c0_44], %41 {strides = array<i32>} : memref<4x8x16xf32, #tpu.memory_space<vmem>>, vector<4x8x16xf32>,
    } else {
    }
    return
  }
  func.func @transform_0(%arg0: i32, %arg1: i32, %arg2: i32) -> (i32, i32, i32, i32) {
    %c0_i32 = arith.constant 0 : i32
    %c0_i32_0 = arith.constant 0 : i32
    %c0_i32_1 = arith.constant 0 : i32
    return %arg0, %c0_i32, %c0_i32_0, %arg1 : i32, i32, i32, i32
  }
  func.func @transform_1(%arg0: i32, %arg1: i32, %arg2: i32) -> (i32, i32, i32, i32) {
    %c1_i32 = arith.constant 1 : i32
    %c0_i32 = arith.constant 0 : i32
    %c0_i32_0 = arith.constant 0 : i32
    return %arg0, %c1_i32, %c0_i32, %arg2 : i32, i32, i32, i32
  }
  func.func @transform_2(%arg0: i32, %arg1: i32, %arg2: i32) -> (i32, i32, i32, i32) {
    %c2_i32 = arith.constant 2 : i32
    %c0_i32 = arith.constant 0 : i32
    %c0_i32_0 = arith.constant 0 : i32
    return %arg0, %c2_i32, %c0_i32, %arg2 : i32, i32, i32, i32
  }
  func.func @transform_3(%arg0: i32, %arg1: i32, %arg2: i32) -> (i32, i32, i32) {
    %c0_i32 = arith.constant 0 : i32
    %c0_i32_0 = arith.constant 0 : i32
    return %arg0, %c0_i32, %arg1 : i32, i32, i32
  }
}

</mosaic_0001>

<bundles_post_ra>
// kernel: tpu_custom_call.1
= control target key start
LH: loop header
LB: loop body
LE: loop exit
PB: predicated region body
PF: predicated region fallthrough
CT: control target
= control target key end

     0   :  { %8 = vsyncpa [#allocation6], 0  ;;  %s1556_s0 = inlined_call_operand.hbm [shape: f32[4,3,8,16], index: 0, kind: input, shape index: {}]   ;;  %s1557_s1 = inlined_call_operand.hbm [shape: f32[4,3,8,16], index: 1, kind: input, shape index: {}]   ;;  %s1558_s2 = inlined_call_operand.hbm [shape: f32[4,3,8,16], index: 2, kind: input, shape index: {}]   ;;  %s1559_s3 = inlined_call_operand.hbm [shape: f32[4,8,16], index: 3, kind: output, shape index: {}]  }
   0x1   :  { %9 = vsyncpa [#allocation9], 0 }
   0x2   :  { %10 = vsyncpa [#allocation7], 0  ;;  %s1377_s14 = scalar_lea.hbm %s1557_s1, 128  ;;  %s1343_s15 = smov [#allocation8]  }
   0x3   :  { %s29_s16 = sshll.u32 %s1343_s15, 4  ;;  %s1344_s17 = smov [#allocation5]   ;;  %s30_s16 = int_to_ptr.vmem [resolvable:$true] %s29_s16 }
   0x4   :  { %s16_s18 = sshll.u32 %s1344_s17, 4  ;;  %s1267_s21 = scalar_lea.hbm %s1557_s1, 640  ;;  %s1379_s18 = int_to_ptr.vmem [resolvable:$true] %s16_s18 }
   0x5   :  { %p1244_p0 = scmp.ne.s32.totalorder %s1377_s14, %s1267_s21  ;;  %s1245_s24 = scalar_lea.hbm %s1557_s1, 1536 }
   0x6   :  { %p1246_p1 = scmp.lt.u32.totalorder %s1377_s14, %s1557_s1  ;;  %p1247_p2 = scmp.lt.u32.totalorder %s1245_s24, %s1267_s21 }
   0x7   :  { %p1249_p4 = scmp.lt.u32.totalorder %s1267_s21, %s1377_s14 }
   0x8   :  { %p1248_p3 = por %p1247_p2, %p1246_p1 }
   0xa   :  { %p1250_p5 = por %p1249_p4, %p1248_p3 }
   0xc   :  { %p1251_p6 = pnand %p1250_p5, %p1244_p0 }
   0xe   :  { %1254 = shalt.err (!%p1251_p6)
}
   0xf   :  { %s1255_s27 = scalar_lea.vmem %s30_s16, 512  ;;  %p1260_p8 = scmp.lt.s32.totalorder %s30_s16, %s30_s16 }
  0x10   :  { %p1256_p7 = scmp.ne.s32.totalorder %s30_s16, %s1255_s27  ;;  %p1261_p9 = scmp.lt.s32.totalorder %s1255_s27, %s1255_s27 }
  0x12   :  { %p1262_p10 = por %p1261_p9, %p1260_p8 }
  0x14   :  { %p1263_p11 = pnand %p1262_p10, %p1256_p7 }
  0x16   :  { %1266 = shalt.err (!%p1263_p11)
}
  0x17   :  { %s1345_s28 = smov 384   ;;  %s1346_s29 = smov 128  }
  0x18   :  { %s1347_s30 = smov 8   ;;  %s1268_s5 = scalar_lea.hbm %s1556_s0, 512 }
  0x19   :  { %35 = dma.hbm_to_vmem [thread:$0]  %s1377_s14, 512, %s30_s16, [#allocation9], %s1345_s28, %s1346_s29, %s1347_s30  }
  0x1a   :  { %p1269_p12 = scmp.ne.s32.totalorder %s1556_s0, %s1268_s5  ;;  %s1270_s10 = scalar_lea.hbm %s1556_s0, 1536 }
  0x1b   :  { %p1271_p13 = scmp.lt.u32.totalorder %s1270_s10, %s1268_s5  ;;  %p1272_p0 = scmp.lt.u32.totalorder %s1268_s5, %s1556_s0 }
  0x1d   :  { %p1273_p1 = por %p1272_p0, %p1271_p13 }
  0x1f   :  { %p1274_p2 = pnand %p1273_p1, %p1269_p12 }
  0x21   :  { %1277 = shalt.err (!%p1274_p2)
}
  0x22   :  { %s1278_s13 = scalar_lea.vmem %s1379_s18, 512  ;;  %p1283_p4 = scmp.lt.s32.totalorder %s1379_s18, %s1379_s18 }
  0x23   :  { %p1279_p3 = scmp.ne.s32.totalorder %s1379_s18, %s1278_s13  ;;  %p1284_p5 = scmp.lt.s32.totalorder %s1278_s13, %s1278_s13 }
  0x25   :  { %p1285_p6 = por %p1284_p5, %p1283_p4 }
  0x27   :  { %p1286_p7 = pnand %p1285_p6, %p1279_p3 }
  0x29   :  { %1289 = shalt.err (!%p1286_p7)
}
  0x2a   :  { %22 = dma.hbm_to_vmem [thread:$0]  %s1556_s0, 512, %s1379_s18, [#allocation6], %s1345_s28, %s1346_s29, %s1347_s30  }
  0x2b   :  { %s41_s19 = scalar_lea.hbm %s1558_s2, 256  ;;  %s1348_s20 = smov [#allocation10]  }
  0x2c   :  { %s42_s21 = sshll.u32 %s1348_s20, 4  ;;  %s1314_s24 = scalar_lea.hbm %s1558_s2, 768  ;;  %s43_s21 = int_to_ptr.vmem [resolvable:$true] %s42_s21 }
  0x2d   :  { %p1291_p8 = scmp.ne.s32.totalorder %s41_s19, %s1314_s24  ;;  %s1292_s27 = scalar_lea.hbm %s1558_s2, 1536 }
  0x2e   :  { %p1293_p9 = scmp.lt.u32.totalorder %s41_s19, %s1558_s2  ;;  %p1294_p10 = scmp.lt.u32.totalorder %s1292_s27, %s1314_s24 }
  0x2f   :  { %p1296_p12 = scmp.lt.u32.totalorder %s1314_s24, %s41_s19 }
  0x30   :  { %p1295_p11 = por %p1294_p10, %p1293_p9 }
  0x32   :  { %p1297_p13 = por %p1296_p12, %p1295_p11 }
  0x34   :  { %p1298_p0 = pnand %p1297_p13, %p1291_p8 }
  0x36   :  { %1301 = shalt.err (!%p1298_p0)
}
  0x37   :  { %s1302_s0 = scalar_lea.vmem %s43_s21, 512  ;;  %p1307_p2 = scmp.lt.s32.totalorder %s43_s21, %s43_s21 }
  0x38   :  { %p1303_p1 = scmp.ne.s32.totalorder %s43_s21, %s1302_s0  ;;  %p1308_p3 = scmp.lt.s32.totalorder %s1302_s0, %s1302_s0 }
  0x3a   :  { %p1309_p4 = por %p1308_p3, %p1307_p2 }
  0x3c   :  { %p1310_p5 = pnand %p1309_p4, %p1303_p1 }
  0x3e   :  { %1313 = shalt.err (!%p1310_p5)
}
  0x3f   :  { %48 = dma.hbm_to_vmem [thread:$0]  %s41_s19, 512, %s43_s21, [#allocation9], %s1345_s28, %s1346_s29, %s1347_s30  }
  0x40   :  { %1337 = dma.done.wait [#allocation6], 512  }
  0x41   :  { %1338 = vsyncadd [#allocation6], 4294966784 }
  0x42   :  { %1339 = dma.done.wait [#allocation9], 1024  }
  0x43   :  { %1340 = vsyncadd [#allocation9], 4294966272  ;;  %v80_v0 = vld [vmem:[#allocation8] sm:$0xff]  ;;  %v82_v1 = vld [vmem:[#allocation8 + $0x10] sm:$0xff]  ;;  %vm124_vm0 = vcmask 64512   ;;  %vm71_vm1 = vcmask 130048   ;;  %v606_v32 = vlaneseq }
  0x44   :  { %92 = vxpose.xlu0.b32.start.end [1/1] (short) (narrow) %v80_v0, 16  ;;  %319 = vxpose.xlu1.b32.start.end [1/1] (short) (narrow) %v82_v1, 16  ;;  %v76_v2 = vld [vmem:[#allocation5] sm:$0xff]  ;;  %v81_v4 = vld [vmem:[#allocation8 + $0x8] sm:$0xff]  ;;  %v83_v5 = vld [vmem:[#allocation8 + $0x18] sm:$0xff]  ;;  %vm62_vm2 = vcmask 122880  }
  0x45   :  { %v88_v3 = vmul.f32 0.35355338, %v76_v2  ;;  %v78_v6 = vld [vmem:[#allocation5 + $0x10] sm:$0xff]  ;;  %v77_v8 = vld [vmem:[#allocation5 + $0x8] sm:$0xff]  ;;  %v79_v10 = vld [vmem:[#allocation5 + $0x18] sm:$0xff]  ;;  %v1349_v20 = vmov -inf  }
  0x46   :  { %v90_v7 = vmul.f32 0.35355338, %v78_v6  ;;  %v89_v9 = vmul.f32 0.35355338, %v77_v8  ;;  %v91_v11 = vmul.f32 0.35355338, %v79_v10 }
  0x47   :  { %1140 = vmatprep.subr.mxu0 %v88_v3  ;;  %63 = vst.msk [vmem:[#allocation2] sm:$0x1] %vm62_vm2, %v1349_v20  ;;  %v1350_v21 = vmov 0.0   ;;  %64 = vst.msk [vmem:[#allocation2 + $0x1] sm:$0x1] %vm62_vm2, %v1349_v20  ;;  %v1351_v22 = vmov 0.0|0.0  }
  0x48   :  { %1141 = vmatpush3.msra.mxu0 %v88_v3  ;;  %1145 = vmatprep.subr.mxu1 %v89_v9  ;;  %67 = vst.msk [vmem:[#allocation3] sm:$0x1] %vm62_vm2, %v1350_v21  ;;  %65 = vst.msk [vmem:[#allocation2 + $0x2] sm:$0x1] %vm62_vm2, %v1349_v20  ;;  %vm1352_vm3 = vmmov 0   ;;  %v607_v41 = vshrl.u32 %v606_v32, 7 }
  0x49   :  { %206 = vxpose.xlu0.b32.start.end [1/1] (short) (narrow) %v81_v4, 16  ;;  %432 = vxpose.xlu1.b32.start.end [1/1] (short) (narrow) %v83_v5, 16  ;;  %66 = vst.msk [vmem:[#allocation2 + $0x3] sm:$0x1] %vm62_vm2, %v1349_v20  ;;  %68 = vst.msk [vmem:[#allocation3 + $0x1] sm:$0x1] %vm62_vm2, %v1350_v21 }
  0x4a   :  { %1150 = vmatprep.subr.mxu0 %v90_v7  ;;  %1146 = vmatpush3.msra.mxu1 %v89_v9  ;;  %69 = vst.msk [vmem:[#allocation3 + $0x2] sm:$0x1] %vm62_vm2, %v1350_v21  ;;  %70 = vst.msk [vmem:[#allocation3 + $0x3] sm:$0x1] %vm62_vm2, %v1350_v21  ;;  %v1484_v53 = vsub.s32 0, %v607_v41  ;;  %s1353_s2 = smov [#allocation11]  }
  0x4b   :  { %1155 = vmatprep.subr.mxu1 %v91_v11  ;;  %72 = vst.msk [vmem:[#allocation4] sm:$0xff] %vm71_vm1, %v1350_v21  ;;  %73 = vst.msk [vmem:[#allocation4 + $0x8] sm:$0xff] %vm71_vm1, %v1350_v21  ;;  %s1091_s18 = sshll.u32 %s1353_s2, 4  ;;  %s1092_s18 = int_to_ptr.vmem [resolvable:$true] %s1091_s18 }
  0x4c   :  { %74 = vst.msk [vmem:[#allocation4 + $0x10] sm:$0xff] %vm71_vm1, %v1350_v21  ;;  %75 = vst.msk [vmem:[#allocation4 + $0x18] sm:$0xff] %vm71_vm1, %v1350_v21  ;;  %s1315_s28 = scalar_lea.vmem %s1092_s18, 512  ;;  %p1320_p7 = scmp.lt.s32.totalorder %s1092_s18, %s1092_s18 }
  0x4d   :  { %p1316_p6 = scmp.ne.s32.totalorder %s1092_s18, %s1315_s28  ;;  %p1321_p8 = scmp.lt.s32.totalorder %s1315_s28, %s1315_s28 }
  0x4e   :  { %v545_v52 = vld [vmem:[#allocation2] sm:$0x1] }
  0x4f   :  { %v547_v63 = vld [vmem:[#allocation2 + $0x2] sm:$0x1]  ;;  %p1322_p9 = por %p1321_p8, %p1320_p7 }
  0x51   :  { %p1323_p10 = pnand %p1322_p9, %p1316_p6 }
  0xc4   :  { %v108_v12 = vpop.trf.xlu0  ;;  %v335_v13 = vpop.trf.xlu1 }
  0xc5   :  { %1142 = vmatprep.mubr.msk.f32.mxu0 %vm124_vm0, %v108_v12 }
  0xc8   :  { %v109_v14 = vpop.trf.xlu0  ;;  %v336_v15 = vpop.trf.xlu1 }
  0xc9   :  { %1143 = vmatmul.mubr.msk.f32.vlgmr.msra.gmra.mrb[0].mxu0 %vm124_vm0, %v109_v14 }
  0xca   :  { %1152 = vmatprep.mubr.msk.f32.mxu0 %vm124_vm0, %v335_v13  ;;  %1151 = vmatpush3.msra.mxu0 %v90_v7 }
  0xcb   :  { %1188 = vmatprep.subr.bf16.mxu0 %v1351_v22 }
  0xcc   :  { %v222_v16 = vpop.trf.xlu0  ;;  %v448_v17 = vpop.trf.xlu1 }
  0xcd   :  { %1147 = vmatprep.mubr.msk.f32.mxu1 %vm124_vm0, %v222_v16  ;;  %1153 = vmatmul.mubr.msk.f32.vlgmr.msra.gmra.mrb[2].mxu0 %vm124_vm0, %v336_v15 }
  0xce   :  { %1164 = vmatprep.mubr.msk.f32.mxu0 %vm1352_vm3, %v1350_v21 }
  0xd0   :  { %v223_v18 = vpop.trf.xlu0  ;;  %v449_v19 = vpop.trf.xlu1 }
  0xd1   :  { %1148 = vmatmul.mubr.msk.f32.vlgmr.msra.gmra.mrb[0].mxu1 %vm124_vm0, %v223_v18 }
  0xd2   :  { %1156 = vmatpush3.msra.mxu1 %v91_v11  ;;  %1157 = vmatprep.mubr.msk.f32.mxu1 %vm124_vm0, %v448_v17  ;;  %v546_v11 = vld [vmem:[#allocation2 + $0x1] sm:$0x1] }
  0xd3   :  { %1191 = vmatprep.subr.bf16.mxu1 %v1351_v22 }
  0xd5   :  { %1158 = vmatmul.mubr.msk.f32.vlgmr.msra.gmra.mrb[2].mxu1 %vm124_vm0, %v449_v19 }
  0xd6   :  { %1171 = vmatprep.mubr.msk.f32.mxu1 %vm1352_vm3, %v1350_v21 }
 0x19c   :  { %v1144_v23 = vpop.f32.mrb[0].mxu0 }
 0x19d   :  { %v551_v24 = vsel %vm71_vm1, %v1144_v23, -inf  ;;  %v197_v25 = vpop.f32.mrb[1].mxu0 }
 0x19e   :  { %v550_v26 = vsel %vm71_vm1, %v197_v25, -inf }
 0x19f   :  { %v552_v27 = vmax.f32 %v550_v26, %v551_v24 }
 0x1a0   :  { %v1154_v28 = vpop.f32.mrb[2].mxu0 }
 0x1a1   :  { %v553_v29 = vrot.slane %v552_v27, 4  ;;  %v569_v30 = vsel %vm71_vm1, %v1154_v28, -inf  ;;  %v423_v31 = vpop.f32.mrb[3].mxu0 }
 0x1a2   :  { %v568_v33 = vsel %vm71_vm1, %v423_v31, -inf }
 0x1a3   :  { %v554_v34 = vmax.f32 %v552_v27, %v553_v29  ;;  %v570_v35 = vmax.f32 %v568_v33, %v569_v30 }
 0x1a4   :  { %v1473_v36 = vpop.f32.mrb[0].mxu1 }
 0x1a5   :  { %v555_v37 = vrot.slane %v554_v34, 2  ;;  %v571_v38 = vrot.slane %v570_v35, 4  ;;  %v560_v39 = vsel %vm71_vm1, %v1473_v36, -inf  ;;  %v310_v40 = vpop.f32.mrb[1].mxu1 }
 0x1a6   :  { %v559_v42 = vsel %vm71_vm1, %v310_v40, -inf }
 0x1a7   :  { %v556_v43 = vmax.f32 %v554_v34, %v555_v37  ;;  %v572_v44 = vmax.f32 %v570_v35, %v571_v38  ;;  %v561_v45 = vmax.f32 %v559_v42, %v560_v39 }
 0x1a8   :  { %v1478_v46 = vpop.f32.mrb[2].mxu1 }
 0x1a9   :  { %v557_v47 = vrot.slane %v556_v43, 1  ;;  %v573_v48 = vrot.slane %v572_v44, 2  ;;  %v562_v49 = vrot.slane %v561_v45, 4  ;;  %v578_v50 = vsel %vm71_vm1, %v1478_v46, -inf  ;;  %v1482_v51 = vpop.f32.mrb[3].mxu1 }
 0x1aa   :  { %v577_v54 = vsel %vm71_vm1, %v1482_v51, -inf }
 0x1ab   :  { %v558_v55 = vmax.f32 %v556_v43, %v557_v47  ;;  %v574_v56 = vmax.f32 %v572_v44, %v573_v48  ;;  %v563_v57 = vmax.f32 %v561_v45, %v562_v49  ;;  %v579_v58 = vmax.f32 %v577_v54, %v578_v50  ;;  %v84_v50 = vld [vmem:[#allocation10] sm:$0xff] }
 0x1ad   :  { %v586_v59 = vmax.f32 %v545_v52, %v558_v55  ;;  %v575_v60 = vrot.slane %v574_v56, 1  ;;  %v564_v61 = vrot.slane %v563_v57, 2  ;;  %v580_v62 = vrot.slane %v579_v58, 4 }
 0x1af   :  { %v609_v0 = vrot.slane %v586_v59, %v1484_v53  ;;  %1035 = vst.msk [vmem:[#allocation2] sm:$0x1] %vm62_vm2, %v586_v59  ;;  %v576_v1 = vmax.f32 %v574_v56, %v575_v60  ;;  %v565_v2 = vmax.f32 %v563_v57, %v564_v61  ;;  %v581_v3 = vmax.f32 %v579_v58, %v580_v62  ;;  %v86_v61 = vld [vmem:[#allocation10 + $0x10] sm:$0xff] }
 0x1b0   :  { %v590_v19 = vsub.f32 %v545_v52, %v586_v59 }
 0x1b1   :  { %v626_v4 = vsub.f32 %v197_v25, %v609_v0  ;;  %v627_v5 = vsub.f32 %v1144_v23, %v609_v0  ;;  %v588_v6 = vmax.f32 %v547_v63, %v576_v1  ;;  %v566_v7 = vrot.slane %v565_v2, 1  ;;  %v548_v25 = vld [vmem:[#allocation2 + $0x3] sm:$0x1] }
 0x1b2   :  { %v582_v8 = vrot.slane %v581_v3, 2  ;;  %v594_v32 = vmul.f32 1.442695, %v590_v19 }
 0x1b3   :  { %v634_v9 = vmul.f32 1.442695, %v626_v4  ;;  %v636_v10 = vmul.f32 1.442695, %v627_v5  ;;  %1037 = vst.msk [vmem:[#allocation2 + $0x2] sm:$0x1] %vm62_vm2, %v588_v6  ;;  %v617_v12 = vrot.slane %v588_v6, %v1484_v53  ;;  %v567_v13 = vmax.f32 %v565_v2, %v566_v7 }
 0x1b4   :  { %v583_v14 = vmax.f32 %v581_v3, %v582_v8 }
 0x1b5   :  { %1211 = vpow2.f32 %v634_v9  ;;  %v630_v15 = vsub.f32 %v423_v31, %v617_v12  ;;  %v631_v16 = vsub.f32 %v1154_v28, %v617_v12  ;;  %v587_v17 = vmax.f32 %v546_v11, %v567_v13 }
 0x1b6   :  { %1213 = vpow2.f32 %v636_v10  ;;  %v584_v18 = vrot.slane %v583_v14, 1  ;;  %v592_v31 = vsub.f32 %v547_v63, %v588_v6  ;;  %v650_v6 = vld [vmem:[#allocation3] sm:$0x1]  ;;  %v85_v10 = vld [vmem:[#allocation10 + $0x8] sm:$0xff] }
 0x1b7   :  { %v642_v20 = vmul.f32 1.442695, %v630_v15  ;;  %v644_v23 = vmul.f32 1.442695, %v631_v16  ;;  %v613_v24 = vrot.slane %v587_v17, %v1484_v53  ;;  %1036 = vst.msk [vmem:[#allocation2 + $0x1] sm:$0x1] %vm62_vm2, %v587_v17  ;;  %v591_v42 = vsub.f32 %v546_v11, %v587_v17 }
 0x1b8   :  { %v585_v26 = vmax.f32 %v583_v14, %v584_v18 }
 0x1b9   :  { %1215 = vpow2.f32 %v642_v20  ;;  %v628_v27 = vsub.f32 %v310_v40, %v613_v24  ;;  %v629_v29 = vsub.f32 %v1473_v36, %v613_v24  ;;  %v598_v40 = vmul.f32 1.442695, %v592_v31 }
 0x1ba   :  { %1217 = vpow2.f32 %v644_v23  ;;  %v589_v30 = vmax.f32 %v548_v25, %v585_v26  ;;  %v596_v52 = vmul.f32 1.442695, %v591_v42  ;;  %v652_v26 = vld [vmem:[#allocation3 + $0x2] sm:$0x1] }
 0x1bb   :  { %v638_v28 = vmul.f32 1.442695, %v628_v27  ;;  %v640_v33 = vmul.f32 1.442695, %v629_v29 }
 0x1bc   :  { %v621_v34 = vrot.slane %v589_v30, %v1484_v53  ;;  %1038 = vst.msk [vmem:[#allocation2 + $0x3] sm:$0x1] %vm62_vm2, %v589_v30  ;;  %v593_v56 = vsub.f32 %v548_v25, %v589_v30  ;;  %v87_v30 = vld [vmem:[#allocation10 + $0x18] sm:$0xff] }
 0x1bd   :  { %1219 = vpow2.f32 %v638_v28 }
 0x1be   :  { %1221 = vpow2.f32 %v640_v33  ;;  %v632_v37 = vsub.f32 %v1482_v51, %v621_v34  ;;  %v633_v38 = vsub.f32 %v1478_v46, %v621_v34  ;;  %v600_v4 = vmul.f32 1.442695, %v593_v56 }
 0x1bf   :  { %v1212_v35 = vpop.eup %1211  ;;  %1223 = vpow2.f32 %v594_v32 }
 0x1c0   :  { %v1214_v39 = vpop.eup %1213  ;;  %v658_v36 = vsel %vm71_vm1, %v1212_v35, 0.0  ;;  %v646_v43 = vmul.f32 1.442695, %v632_v37  ;;  %v648_v44 = vmul.f32 1.442695, %v633_v38 }
 0x1c1   :  { %v659_v41 = vsel %vm71_vm1, %v1214_v39, 0.0  ;;  %v1189_v47 = vpack.c.bf16 %v1214_v39, %v1212_v35  ;;  %v651_v35 = vld [vmem:[#allocation3 + $0x1] sm:$0x1] }
 0x1c2   :  { %v660_v45 = vadd.f32 %v659_v41, %v658_v36  ;;  %1225 = vpow2.f32 %v646_v43 }
 0x1c3   :  { %v1216_v48 = vpop.eup %1215  ;;  %1227 = vpow2.f32 %v648_v44  ;;  %1190 = vmatpush3.bf16.msra.mxu0 %v1189_v47  ;;  %v653_v44 = vld [vmem:[#allocation3 + $0x3] sm:$0x1] }
 0x1c4   :  { %v661_v49 = vrot.slane %v660_v45, 4  ;;  %v1218_v51 = vpop.eup %1217  ;;  %1229 = vpow2.f32 %v598_v40  ;;  %v676_v46 = vsel %vm71_vm1, %v1216_v48, 0.0  ;;  %1194 = vmatprep.subr.bf16.mxu0 %v1351_v22 }
 0x1c5   :  { %v677_v55 = vsel %vm71_vm1, %v1218_v51, 0.0  ;;  %v1195_v57 = vpack.c.bf16 %v1218_v51, %v1216_v48  ;;  %1231 = vpow2.f32 %v596_v52 }
 0x1c6   :  { %v662_v54 = vadd.f32 %v661_v49, %v660_v45  ;;  %v678_v58 = vadd.f32 %v677_v55, %v676_v46  ;;  %1165 = vmatmul.mubr.msk.f32.vlgmr.msra.gmra.mrb[4].mxu0 %vm71_vm1, %v84_v50  ;;  %1233 = vpow2.f32 %v600_v4  ;;  %v703_v46 = vld [vmem:[#allocation4] sm:$0xff] }
 0x1c7   :  { %v1220_v59 = vpop.eup %1219  ;;  %1196 = vmatpush3.bf16.msra.mxu0 %v1195_v57  ;;  %1178 = vmatprep.mubr.msk.f32.mxu0 %vm1352_vm3, %v1350_v21  ;;  %v705_v57 = vld [vmem:[#allocation4 + $0x10] sm:$0xff] }
 0x1c8   :  { %v663_v60 = vrot.slane %v662_v54, 2  ;;  %v1222_v62 = vpop.eup %1221  ;;  %v679_v63 = vrot.slane %v678_v58, 4  ;;  %v667_v0 = vsel %vm71_vm1, %v1220_v59, 0.0 }
 0x1c9   :  { %v1508_v1 = vpop.eup %1223  ;;  %v668_v3 = vsel %vm71_vm1, %v1222_v62, 0.0  ;;  %v1192_v5 = vpack.c.bf16 %v1222_v62, %v1220_v59 }
 0x1ca   :  { %v664_v2 = vadd.f32 %v663_v60, %v662_v54  ;;  %v680_v7 = vadd.f32 %v679_v63, %v678_v58  ;;  %v669_v8 = vadd.f32 %v668_v3, %v667_v0  ;;  %1179 = vmatmul.mubr.msk.f32.vlgmr.msra.gmra.mrb[6].mxu0 %vm71_vm1, %v86_v61  ;;  %v654_v15 = vmul.f32 %v1508_v1, %v650_v6  ;;  %v704_v0 = vld [vmem:[#allocation4 + $0x8] sm:$0xff] }
 0x1cb   :  { %1193 = vmatpush3.bf16.msra.mxu1 %v1192_v5  ;;  %v714_v51 = vrot.slane %v1508_v1, %v1484_v53 }
 0x1cc   :  { %v665_v9 = vrot.slane %v664_v2, 1  ;;  %v1226_v11 = vpop.eup %1225  ;;  %v681_v12 = vrot.slane %v680_v7, 2  ;;  %v670_v13 = vrot.slane %v669_v8, 4  ;;  %1197 = vmatprep.subr.bf16.mxu1 %v1351_v22 }
 0x1cd   :  { %v1228_v14 = vpop.eup %1227  ;;  %v685_v17 = vsel %vm71_vm1, %v1226_v11, 0.0  ;;  %v731_v54 = vmul.f32 %v714_v51, %v703_v46 }
 0x1ce   :  { %v666_v16 = vadd.f32 %v665_v9, %v664_v2  ;;  %v1230_v18 = vpop.eup %1229  ;;  %v682_v19 = vadd.f32 %v681_v12, %v680_v7  ;;  %v671_v20 = vadd.f32 %v670_v13, %v669_v8  ;;  %v686_v23 = vsel %vm71_vm1, %v1228_v14, 0.0  ;;  %1172 = vmatmul.mubr.msk.f32.vlgmr.msra.gmra.mrb[4].mxu1 %vm71_vm1, %v85_v10  ;;  %v706_v10 = vld [vmem:[#allocation4 + $0x18] sm:$0xff] }
 0x1cf   :  { %v1198_v24 = vpack.c.bf16 %v1228_v14, %v1226_v11  ;;  %v687_v27 = vadd.f32 %v686_v23, %v685_v17  ;;  %1185 = vmatprep.mubr.msk.f32.mxu1 %vm1352_vm3, %v1350_v21  ;;  %v1232_v31 = vpop.eup %1231  ;;  %v656_v28 = vmul.f32 %v1230_v18, %v652_v26  ;;  %v722_v55 = vrot.slane %v1230_v18, %v1484_v53 }
 0x1d0   :  { %v694_v25 = vadd.f32 %v666_v16, %v654_v15  ;;  %v683_v22 = vrot.slane %v682_v19, 1  ;;  %v672_v29 = vrot.slane %v671_v20, 2  ;;  %v655_v21 = vmul.f32 %v1232_v31, %v651_v35  ;;  %v1234_v41 = vpop.eup %1233 }
 0x1d1   :  { %1199 = vmatpush3.bf16.msra.mxu1 %v1198_v24  ;;  %v688_v32 = vrot.slane %v687_v27, 4  ;;  %v657_v47 = vmul.f32 %v1234_v41, %v653_v44  ;;  %v733_v61 = vmul.f32 %v722_v55, %v705_v57  ;;  %v718_v62 = vrot.slane %v1232_v31, %v1484_v53 }
 0x1d2   :  { %699 = vst.msk [vmem:[#allocation3] sm:$0x1] %vm62_vm2, %v694_v25  ;;  %v684_v33 = vadd.f32 %v683_v22, %v682_v19  ;;  %v673_v34 = vadd.f32 %v672_v29, %v671_v20  ;;  %v726_v7 = vrot.slane %v1234_v41, %v1484_v53 }
 0x1d3   :  { %v689_v37 = vadd.f32 %v688_v32, %v687_v27  ;;  %v732_v5 = vmul.f32 %v718_v62, %v704_v0 }
 0x1d4   :  { %1186 = vmatmul.mubr.msk.f32.vlgmr.msra.gmra.mrb[6].mxu1 %vm71_vm1, %v87_v30  ;;  %v696_v38 = vadd.f32 %v684_v33, %v656_v28  ;;  %v674_v39 = vrot.slane %v673_v34, 1  ;;  %v734_v15 = vmul.f32 %v726_v7, %v706_v10 }
 0x1d5   :  { %v690_v36 = vrot.slane %v689_v37, 2 }
 0x1d6   :  { %701 = vst.msk [vmem:[#allocation3 + $0x2] sm:$0x1] %vm62_vm2, %v696_v38  ;;  %v675_v40 = vadd.f32 %v674_v39, %v673_v34 }
 0x1d7   :  { %v691_v42 = vadd.f32 %v690_v36, %v689_v37 }
 0x1d8   :  { %v695_v43 = vadd.f32 %v675_v40, %v655_v21 }
 0x1d9   :  { %v692_v45 = vrot.slane %v691_v42, 1  ;;  %v1042_v50 = vld [vmem:[#allocation3] sm:$0x1] }
 0x1da   :  { %700 = vst.msk [vmem:[#allocation3 + $0x1] sm:$0x1] %vm62_vm2, %v695_v43  ;;  %1235 = vrcp.f32 %v1042_v50 }
 0x1db   :  { %v693_v48 = vadd.f32 %v692_v45, %v691_v42 }
 0x1dd   :  { %v697_v49 = vadd.f32 %v693_v48, %v657_v47  ;;  %v1044_v52 = vld [vmem:[#allocation3 + $0x2] sm:$0x1] }
 0x1de   :  { %1237 = vrcp.f32 %v1044_v52 }
 0x1df   :  { %702 = vst.msk [vmem:[#allocation3 + $0x3] sm:$0x1] %vm62_vm2, %v697_v49 }
 0x1e1   :  { %v1043_v60 = vld [vmem:[#allocation3 + $0x1] sm:$0x1] }
 0x1e2   :  { %1239 = vrcp.f32 %v1043_v60 }
 0x1e4   :  { %v1236_v3 = vpop.eup %1235 }
 0x1e5   :  { %v1061_v11 = vrot.slane %v1236_v3, %v1484_v53 }
 0x1e6   :  { %v1045_v4 = vld [vmem:[#allocation3 + $0x3] sm:$0x1] }
 0x1e7   :  { %1241 = vrcp.f32 %v1045_v4 }
 0x1e8   :  { %v1238_v12 = vpop.eup %1237 }
 0x1e9   :  { %v1069_v17 = vrot.slane %v1238_v12, %v1484_v53 }
 0x1ec   :  { %v1240_v18 = vpop.eup %1239 }
 0x1ed   :  { %v1065_v25 = vrot.slane %v1240_v18, %v1484_v53 }
 0x1f1   :  { %v1242_v27 = vpop.eup %1241 }
 0x1f2   :  { %v1073_v29 = vrot.slane %v1242_v27, %v1484_v53 }
 0x299   :  { %v804_v56 = vpop.f32.mrb[4].mxu0 }
 0x29a   :  { %v1027_v58 = vadd.f32 %v804_v56, %v731_v54  ;;  %v1166_v59 = vpop.f32.mrb[5].mxu0 }
 0x29c   :  { %1031 = vst.msk [vmem:[#allocation4] sm:$0xff] %vm71_vm1, %v1027_v58 }
 0x29d   :  { %v950_v63 = vpop.f32.mrb[6].mxu0 }
 0x29e   :  { %v1029_v1 = vadd.f32 %v950_v63, %v733_v61  ;;  %v1180_v2 = vpop.f32.mrb[7].mxu0 }
 0x2a0   :  { %1033 = vst.msk [vmem:[#allocation4 + $0x10] sm:$0xff] %vm71_vm1, %v1029_v1 }
 0x2a1   :  { %v877_v6 = vpop.f32.mrb[4].mxu1 }
 0x2a2   :  { %v1028_v8 = vadd.f32 %v877_v6, %v732_v5  ;;  %v1173_v9 = vpop.f32.mrb[5].mxu1 }
 0x2a3   :  { %v1050_v13 = vld [vmem:[#allocation4] sm:$0xff] }
 0x2a4   :  { %1032 = vst.msk [vmem:[#allocation4 + $0x8] sm:$0xff] %vm71_vm1, %v1028_v8  ;;  %v1078_v14 = vmul.f32 %v1061_v11, %v1050_v13 }
 0x2a6   :  { %1082 = vst.msk [vmem:[#allocation11] sm:$0xff] %vm71_vm1, %v1078_v14 }
 0x2a7   :  { %v1023_v16 = vpop.f32.mrb[6].mxu1  ;;  %v1052_v23 = vld [vmem:[#allocation4 + $0x10] sm:$0xff] }
 0x2a8   :  { %v1030_v19 = vadd.f32 %v1023_v16, %v734_v15  ;;  %v1187_v20 = vpop.f32.mrb[7].mxu1  ;;  %v1080_v24 = vmul.f32 %v1069_v17, %v1052_v23 }
 0x2aa   :  { %1034 = vst.msk [vmem:[#allocation4 + $0x18] sm:$0xff] %vm71_vm1, %v1030_v19  ;;  %1084 = vst.msk [vmem:[#allocation11 + $0x10] sm:$0xff] %vm71_vm1, %v1080_v24 }
 0x2ab   :  { %v1051_v26 = vld [vmem:[#allocation4 + $0x8] sm:$0xff] }
 0x2ac   :  { %v1079_v22 = vmul.f32 %v1065_v25, %v1051_v26 }
 0x2ae   :  { %1083 = vst.msk [vmem:[#allocation11 + $0x8] sm:$0xff] %vm71_vm1, %v1079_v22 }
 0x2b1   :  { %v1053_v30 = vld [vmem:[#allocation4 + $0x18] sm:$0xff] }
 0x2b2   :  { %v1081_v32 = vmul.f32 %v1073_v29, %v1053_v30 }
 0x2b4   :  { %1085 = vst.msk [vmem:[#allocation11 + $0x18] sm:$0xff] %vm71_vm1, %v1081_v32 }
 0x2b5   :  { %1326 = shalt.err (!%p1323_p10)
}
 0x2b6   :  { %s1327_s7 = scalar_lea.hbm %s1559_s3, 512 }
 0x2b7   :  { %p1328_p11 = scmp.ne.s32.totalorder %s1559_s3, %s1327_s7  ;;  %p1331_p12 = scmp.lt.u32.totalorder %s1327_s7, %s1559_s3 }
 0x2b9   :  { %p1333_p13 = pnand %p1331_p12, %p1328_p11 }
 0x2bb   :  { %1336 = shalt.err (!%p1333_p13)
}
 0x2bc   :  { %1097 = dma.vmem_to_hbm [thread:$0]  %s1092_s18, 512, %s1559_s3, [#allocation7], %s1346_s29, %s1346_s29, %s1347_s30  }
 0x2bd   :  { %1341 = dma.done.wait [#allocation7], 512  }
 0x2be   :  { %1342 = vsyncadd [#allocation7], 4294966784 }
 0x2bf   :  { %1101 = vsyncpa [#allocation6], 1 }
 0x2c0   :  { %1102 = vsyncpa [#allocation9], 1 }
 0x2c1   :  { %1103 = vsyncpa [#allocation7], 1 }

</bundles_post_ra>
